<compile_context>
chip_gen: v7x
topology: tpu7x:2x2x1
jax: 0.10.0
libtpu: 0.0.40
codegen_flags: <defaults>
</compile_context>

<pallas_src>
import functools

import jax
import jax.numpy as jnp
from jax.experimental import pallas as pl
from jax.experimental.pallas import tpu as pltpu

LANE = 128          # TPU lane width (last dim)
SUBLANE = 8         # f32 sublane count (second-to-last dim)
MAX_TILE_B = 2048   # batch-tile cap; VMEM-safe even on v7x's 64 MiB


def _round_up(x, m):
    return (x + m - 1) // m * m


# ----------------------------------------------------------------------------
# Activations (match torch defaults: LeakyReLU negative_slope = 0.01)
# ----------------------------------------------------------------------------
def _apply_act(y, act):
    if act == 'Sigmoid':
        return jax.nn.sigmoid(y)
    if act == 'Tanh':
        return jnp.tanh(y)
    if act == 'ReLU':
        return jnp.maximum(y, 0.0)
    if act == 'LeakyReLU':
        return jnp.where(y >= 0.0, y, 0.01 * y)
    if act == 'Linear' or act is None:
        return y
    raise ValueError(f"unknown activation {act!r}")


# ----------------------------------------------------------------------------
# Fused whole-network Pallas kernel
# ----------------------------------------------------------------------------
def _fused_mlp_kernel(x_ref, w_ref, b_ref, o_ref, *, ops):
    """Fused forward over a static op sequence.

    x_ref : bf16 [TILE_B, in_p]          lane-padded input tile
    w_ref : bf16 [slab_rows, max_out_p]  all weights, pre-transposed [in, out],
                                         stacked along rows, zero-padded
    b_ref : f32  [nl_pad, max_out_p]     one bias row per linear
    o_ref : f32  [TILE_B, out_p]

    `ops` entries: ('linear', li, row_off, in_p, out_p) or ('act', name).
    All offsets/sizes are static Python ints (128-aligned), so the in-kernel
    slices are free views; the running activation `y` stays in VMEM/vregs.
    """
    y = x_ref[...].astype(jnp.float32)
    for op in ops:
        if op[0] == 'linear':
            _, li, off, k, n = op
            w = w_ref[off:off + k, :n]            # bf16 [k, n]
            b = b_ref[li:li + 1, :n]              # f32  [1, n]
            # bf16 MXU path with f32 accumulator; bias add in f32.
            y = jnp.dot(y.astype(w.dtype), w,
                        preferred_element_type=jnp.float32) + b
        else:
            y = _apply_act(y, op[1])              # elementwise in f32
    o_ref[...] = y.astype(o_ref.dtype)


# ----------------------------------------------------------------------------
# Jitted wrapper: pad -> fused kernel -> slice, cached per static op tuple.
# ----------------------------------------------------------------------------
@functools.partial(jax.jit, static_argnames=("kernel_ops", "num_classes"))
def _fused_forward(x, w_slab, b_slab, *, kernel_ops, num_classes):
    B, F = x.shape
    in_p = _round_up(F, LANE)
    out_p = _round_up(num_classes, LANE)

    # Single grid step whenever the whole batch fits one VMEM-safe tile
    # (fewer serial grid steps = less per-step overhead on v5e/v6e).  Only
    # split for large batches; that axis is "parallel" for v7x's two TCs.
    if B <= MAX_TILE_B:
        tile_b = _round_up(B, 2 * SUBLANE)        # bf16 sublane packing = 16
        b_pad = tile_b
    else:
        tile_b = MAX_TILE_B
        b_pad = _round_up(B, tile_b)

    # bf16 input: halves HBM->VMEM bytes; value is cast to bf16 for the MXU
    # anyway.  Padded lanes/rows are inert (padded weight rows are zero) and
    # the padded batch rows are sliced off below.
    x_pad = jnp.pad(x.astype(jnp.bfloat16), ((0, b_pad - B), (0, in_p - F)))

    kernel = functools.partial(_fused_mlp_kernel, ops=kernel_ops)

    out_pad = pl.pallas_call(
        kernel,
        out_shape=jax.ShapeDtypeStruct((b_pad, out_p), jnp.float32),
        grid=(b_pad // tile_b,),
        in_specs=[
            pl.BlockSpec((tile_b, in_p), lambda i: (i, 0)),
            # Grid-invariant, full-array parameter slabs: one DMA each, stay
            # resident across batch tiles.
            pl.BlockSpec(w_slab.shape, lambda i: (0, 0)),
            pl.BlockSpec(b_slab.shape, lambda i: (0, 0)),
        ],
        out_specs=pl.BlockSpec((tile_b, out_p), lambda i: (i, 0)),
        compiler_params=pltpu.CompilerParams(
            dimension_semantics=("parallel",),
            vmem_limit_bytes=32 * 1024 * 1024,
        ),
    )(x_pad, w_slab, b_slab)

    return out_pad[:B, :num_classes]


# ----------------------------------------------------------------------------
# Net (parameter table + dynamic forward), mirroring childNet.Net
# ----------------------------------------------------------------------------
class PallasNet:
    def __init__(self, num_features, num_classes, possible_hidden_units,
                 possible_act_functions, layer_limit, key,
                 param_dtype=jnp.bfloat16):
        del layer_limit  # unused in forward (as in the reference module)
        self.num_features = num_features
        self.num_classes = num_classes
        self.param_dtype = param_dtype

        hid_layers = list(possible_hidden_units[1:])
        if num_features not in hid_layers:
            hid_layers.append(num_features)
        if num_classes not in hid_layers:
            hid_layers.append(num_classes)
        self.hid_dims = hid_layers
        self.act_names = list(possible_act_functions)

        # reset_param equivalent: uniform(-0.025, 0.025).  Weights are stored
        # pre-transposed [in, out] and zero-padded to multiples of 128 so the
        # kernel is lane-dense and transpose-free.
        # TODO(synk): for bit-exact float32 torch parity keep params f32 and
        # pass precision=jax.lax.Precision.HIGHEST to the in-kernel dot.
        init_range = 0.025
        self.params = {}
        idx = 0
        for in_dim in hid_layers:
            for out_dim in hid_layers:
                kw = jax.random.fold_in(key, 2 * idx)
                kb = jax.random.fold_in(key, 2 * idx + 1)
                w = jax.random.uniform(kw, (out_dim, in_dim), jnp.float32,
                                       -init_range, init_range)
                b = jax.random.uniform(kb, (out_dim,), jnp.float32,
                                       -init_range, init_range)
                in_p = _round_up(in_dim, LANE)
                out_p = _round_up(out_dim, LANE)
                w_pad = jnp.zeros((in_p, out_p), param_dtype)
                w_pad = w_pad.at[:in_dim, :out_dim].set(
                    w.T.astype(param_dtype))
                b_pad = jnp.zeros((1, out_p), jnp.float32)
                b_pad = b_pad.at[:, :out_dim].set(b[None, :])
                self.params[(in_dim, out_dim)] = (w_pad, b_pad)
                idx += 1
        # TODO(synk): Adam optimizer state from __init__ is training-only and
        # not part of the forward pass; omitted.

        self._spec_cache = {}  # ops tuple -> (kernel_ops, w_slab, b_slab)

    # Build the op sequence exactly like Net.forward.
    def _build_ops(self, layers):
        ops = []
        prev = self.num_features
        for layer in layers:
            if isinstance(layer, int):
                ops.append(('linear', prev, layer))
                prev = layer
            elif layer == 'EOS':
                break
            else:
                ops.append(('act', layer))
        ops.append(('linear', prev, self.num_classes))
        return tuple(ops)

    # Pack all params for this spec into single weight/bias slabs (one DMA
    # each) and build the static kernel op tuple.  Cached per spec.
    def _compile_spec(self, ops):
        if ops in self._spec_cache:
            return self._spec_cache[ops]
        lin = [(op[1], op[2]) for op in ops if op[0] == 'linear']
        max_out_p = max(_round_up(o, LANE) for _, o in lin)

        w_rows, b_rows, kernel_ops = [], [], []
        off = 0
        li = 0
        for op in ops:
            if op[0] == 'linear':
                in_dim, out_dim = op[1], op[2]
                in_p = _round_up(in_dim, LANE)
                out_p = _round_up(out_dim, LANE)
                w_pad, b_pad = self.params[(in_dim, out_dim)]
                w_rows.append(jnp.pad(w_pad, ((0, 0), (0, max_out_p - out_p))))
                b_rows.append(jnp.pad(b_pad, ((0, 0), (0, max_out_p - out_p))))
                kernel_ops.append(('linear', li, off, in_p, out_p))
                off += in_p
                li += 1
            else:
                kernel_ops.append(op)

        w_slab = jnp.concatenate(w_rows, axis=0)          # bf16 [off, max_out_p]
        b_slab = jnp.concatenate(b_rows, axis=0)          # f32  [li, max_out_p]
        nl_pad = _round_up(li, SUBLANE)
        if nl_pad > li:
            b_slab = jnp.pad(b_slab, ((0, nl_pad - li), (0, 0)))

        entry = (tuple(kernel_ops), w_slab, b_slab)
        self._spec_cache[ops] = entry
        return entry

    def forward(self, x, layers):
        ops = self._build_ops(layers)
        kernel_ops, w_slab, b_slab = self._compile_spec(ops)
        return _fused_forward(x, w_slab, b_slab,
                              kernel_ops=kernel_ops,
                              num_classes=self.num_classes)

    # Pure-JAX reference (same bf16 math, unpadded) for correctness checking.
    def forward_ref(self, x, layers):
        ops = self._build_ops(layers)
        y = x.astype(jnp.bfloat16).astype(jnp.float32)  # kernel feeds x as bf16
        for op in ops:
            if op[0] == 'linear':
                in_dim, out_dim = op[1], op[2]
                w_pad, b_pad = self.params[(in_dim, out_dim)]
                w = w_pad[:in_dim, :out_dim]            # bf16 [in, out]
                b = b_pad[:, :out_dim]                  # f32  [1, out]
                y = jnp.dot(y.astype(w.dtype), w,
                            preferred_element_type=jnp.float32) + b
            else:
                y = _apply_act(y, op[1])
        return y


# ----------------------------------------------------------------------------
# Demo
# ----------------------------------------------------------------------------
if __name__ == "__main__":
    key = jax.random.PRNGKey(0)

    num_features = 32
    num_classes = 8
    possible_hidden_units = [0, 16, 64]          # [1:] used, like the module
    possible_act_functions = ['Sigmoid', 'Tanh', 'ReLU', 'LeakyReLU', 'Linear']
    layer_limit = 4

    net = PallasNet(num_features, num_classes, possible_hidden_units,
                    possible_act_functions, layer_limit,
                    key=jax.random.fold_in(key, 123))

    batch = 64
    x = jax.random.normal(jax.random.fold_in(key, 7), (batch, num_features),
                          dtype=jnp.float32)

    # Example architecture specs, as the controller would emit them.
    specs = [
        [64, 'ReLU', 16, 'Tanh', 'EOS', 64],     # everything after EOS ignored
        ['Sigmoid', 64, 'LeakyReLU', 16],
    ]
    for layers in specs:
        out = jax.block_until_ready(net.forward(x, layers))
        ref = net.forward_ref(x, layers)
        assert out.shape == (batch, num_classes), out.shape
        assert jnp.allclose(out, ref, atol=1e-3, rtol=1e-3), \
            f"mismatch vs JAX reference for spec {layers}"

    print("KERNEL_OK")
</pallas_src>

<mosaic_0001>
module attributes {stable_mosaic.version = 11 : i64} {
  func.func @_fused_mlp_kernel(%arg0: i32, %arg1: memref<64x128xbf16, #tpu.memory_space<vmem>>, %arg2: memref<384x128xbf16, #tpu.memory_space<vmem>>, %arg3: memref<8x128xf32, #tpu.memory_space<vmem>>, %arg4: memref<64x128xf32, #tpu.memory_space<vmem>>) attributes {dimension_semantics = [#tpu.dimension_semantics<parallel>], iteration_bounds = array<i64: 1>, scalar_prefetch = 0 : i64, scratch_operands = 0 : i64, tpu.core_type = #tpu.core_type<tc>, window_params = [{transform_indices = @transform_0, window_bounds = array<i64: 64, 128>}, {pipeline_mode = #tpu.pipeline_mode<synchronous>, transform_indices = @transform_1, window_bounds = array<i64: 384, 128>}, {pipeline_mode = #tpu.pipeline_mode<synchronous>, transform_indices = @transform_2, window_bounds = array<i64: 8, 128>}, {transform_indices = @transform_3, window_bounds = array<i64: 64, 128>}]} {
    %c0 = arith.constant 0 : index
    %c0_0 = arith.constant 0 : index
    %0 = vector.load %arg1[%c0, %c0_0] : memref<64x128xbf16, #tpu.memory_space<vmem>>, vector<64x128xbf16>
    %1 = arith.extf %0 : vector<64x128xbf16> to vector<64x128xf32>
    %c0_1 = arith.constant 0 : index
    %c0_2 = arith.constant 0 : index
    %2 = vector.load %arg2[%c0_1, %c0_2] : memref<384x128xbf16, #tpu.memory_space<vmem>>, vector<128x128xbf16>
    %c0_3 = arith.constant 0 : index
    %c0_4 = arith.constant 0 : index
    %3 = vector.load %arg3[%c0_3, %c0_4] : memref<8x128xf32, #tpu.memory_space<vmem>>, vector<1x128xf32>
    %4 = arith.truncf %1 : vector<64x128xf32> to vector<64x128xbf16>
    %cst = arith.constant dense<0.000000e+00> : vector<64x128xf32>
    %5 = tpu.matmul %4, %2, %cst {dimension_numbers = #tpu.dot_dimension_numbers<[1], [0], [0], [1], [0, 0, 1, 1], [], []>} : vector<64x128xbf16>, vector<128x128xbf16>, vector<64x128xf32> -> vector<64x128xf32>
    %6 = vector.broadcast %3 : vector<1x128xf32> to vector<64x128xf32>
    %7 = arith.addf %5, %6 : vector<64x128xf32>
    %cst_5 = arith.constant 0.000000e+00 : f32
    %8 = vector.broadcast %cst_5 : f32 to vector<64x128xf32>
    %9 = arith.maximumf %7, %8 : vector<64x128xf32>
    %c128 = arith.constant 128 : index
    %c0_6 = arith.constant 0 : index
    %10 = vector.load %arg2[%c128, %c0_6] : memref<384x128xbf16, #tpu.memory_space<vmem>>, vector<128x128xbf16>
    %c1 = arith.constant 1 : index
    %c0_7 = arith.constant 0 : index
    %11 = vector.load %arg3[%c1, %c0_7] : memref<8x128xf32, #tpu.memory_space<vmem>>, vector<1x128xf32>
    %12 = arith.truncf %9 : vector<64x128xf32> to vector<64x128xbf16>
    %cst_8 = arith.constant dense<0.000000e+00> : vector<64x128xf32>
    %13 = tpu.matmul %12, %10, %cst_8 {dimension_numbers = #tpu.dot_dimension_numbers<[1], [0], [0], [1], [0, 0, 1, 1], [], []>} : vector<64x128xbf16>, vector<128x128xbf16>, vector<64x128xf32> -> vector<64x128xf32>
    %14 = vector.broadcast %11 : vector<1x128xf32> to vector<64x128xf32>
    %15 = arith.addf %13, %14 : vector<64x128xf32>
    %16 = math.tanh %15 : vector<64x128xf32>
    %c256 = arith.constant 256 : index
    %c0_9 = arith.constant 0 : index
    %17 = vector.load %arg2[%c256, %c0_9] : memref<384x128xbf16, #tpu.memory_space<vmem>>, vector<128x128xbf16>
    %c2 = arith.constant 2 : index
    %c0_10 = arith.constant 0 : index
    %18 = vector.load %arg3[%c2, %c0_10] : memref<8x128xf32, #tpu.memory_space<vmem>>, vector<1x128xf32>
    %19 = arith.truncf %16 : vector<64x128xf32> to vector<64x128xbf16>
    %cst_11 = arith.constant dense<0.000000e+00> : vector<64x128xf32>
    %20 = tpu.matmul %19, %17, %cst_11 {dimension_numbers = #tpu.dot_dimension_numbers<[1], [0], [0], [1], [0, 0, 1, 1], [], []>} : vector<64x128xbf16>, vector<128x128xbf16>, vector<64x128xf32> -> vector<64x128xf32>
    %21 = vector.broadcast %18 : vector<1x128xf32> to vector<64x128xf32>
    %22 = arith.addf %20, %21 : vector<64x128xf32>
    %c0_12 = arith.constant 0 : index
    %c0_13 = arith.constant 0 : index
    %23 = vector.load %arg4[%c0_12, %c0_13] : memref<64x128xf32, #tpu.memory_space<vmem>>, vector<64x128xf32>
    tpu.vector_store %arg4[%c0_12, %c0_13], %22 {strides = array<i32>} : memref<64x128xf32, #tpu.memory_space<vmem>>, vector<64x128xf32>,
    return
  }
  func.func @transform_0(%arg0: i32) -> (i32, i32) {
    %c0_i32 = arith.constant 0 : i32
    %c0_i32_0 = arith.constant 0 : i32
    return %arg0, %c0_i32 : i32, i32
  }
  func.func @transform_1(%arg0: i32) -> (i32, i32) {
    %c0_i32 = arith.constant 0 : i32
    %c0_i32_0 = arith.constant 0 : i32
    %c0_i32_1 = arith.constant 0 : i32
    return %c0_i32, %c0_i32_0 : i32, i32
  }
  func.func @transform_2(%arg0: i32) -> (i32, i32) {
    %c0_i32 = arith.constant 0 : i32
    %c0_i32_0 = arith.constant 0 : i32
    %c0_i32_1 = arith.constant 0 : i32
    return %c0_i32, %c0_i32_0 : i32, i32
  }
  func.func @transform_3(%arg0: i32) -> (i32, i32) {
    %c0_i32 = arith.constant 0 : i32
    %c0_i32_0 = arith.constant 0 : i32
    return %arg0, %c0_i32 : i32, i32
  }
}

</mosaic_0001>

<bundles_post_ra>
// kernel: _fused_forward.1
= control target key start
LH: loop header
LB: loop body
LE: loop exit
PB: predicated region body
PF: predicated region fallthrough
CT: control target
= control target key end

     0   :  { %8 = vsyncpa [#allocation3], 0  ;;  %s726_s12 = smov [#allocation2]   ;;  %s806_s0 = inlined_call_operand.vmem [shape: bf16[64,128], index: 0, kind: input, shape index: {}]   ;;  %s807_s1 = inlined_call_operand.hbm [shape: bf16[384,128], index: 1, kind: input, shape index: {}]   ;;  %s808_s2 = inlined_call_operand.vmem [shape: f32[8,128], index: 2, kind: input, shape index: {}]   ;;  %s809_s3 = inlined_call_operand.vmem [shape: f32[64,128], index: 3, kind: output, shape index: {}]  }
   0x1   :  { %s16_s13 = sshll.u32 %s726_s12, 4  ;;  %s702_s16 = scalar_lea.hbm %s807_s1, 3072  ;;  %s17_s13 = int_to_ptr.vmem [resolvable:$true] %s16_s13 }
   0x2   :  { %p703_p0 = scmp.ne.s32.totalorder %s807_s1, %s702_s16  ;;  %p706_p1 = scmp.lt.u32.totalorder %s702_s16, %s807_s1 }
   0x4   :  { %p708_p2 = pnand %p706_p1, %p703_p0 }
   0x6   :  { %711 = shalt.err (!%p708_p2)
}
   0x7   :  { %s712_s21 = scalar_lea.vmem %s17_s13, 3072  ;;  %p717_p4 = scmp.lt.s32.totalorder %s17_s13, %s17_s13 }
   0x8   :  { %p713_p3 = scmp.ne.s32.totalorder %s17_s13, %s712_s21  ;;  %p718_p5 = scmp.lt.s32.totalorder %s712_s21, %s712_s21 }
   0xa   :  { %p719_p6 = por %p718_p5, %p717_p4 }
   0xc   :  { %p720_p7 = pnand %p719_p6, %p713_p3 }
   0xe   :  { %723 = shalt.err (!%p720_p7)
}
   0xf   :  { %s727_s22 = smov 64   ;;  %s728_s23 = smov 4  }
  0x10   :  { %22 = dma.hbm_to_vmem [thread:$0]  %s807_s1, 3072, %s17_s13, [#allocation3], %s727_s22, %s727_s22, %s728_s23  }
  0x11   :  { %724 = dma.done.wait [#allocation3], 3072  }
  0x12   :  { %725 = vsyncadd [#allocation3], 4294964224  ;;  %v658_v0 = vld [vmem:[#allocation2] sm:$0xff]   ;;  %v659_v1 = vld [vmem:[#allocation2 + $0x8] sm:$0xff]  }
  0x13   :  { %567 = vmatprep.subr.bf16.mxu0 %v658_v0  ;;  %v660_v2 = vld [vmem:[#allocation2 + $0x10] sm:$0xff]   ;;  %v661_v3 = vld [vmem:[#allocation2 + $0x18] sm:$0xff]   ;;  %v666_v4 = vld [vmem:[%s806_s0] sm:$0xff]  }
  0x14   :  { %568 = vmatpush3.bf16.msra.mxu0 %v658_v0  ;;  %583 = vmatprep.mubr.bf16.mxu0 %v666_v4  ;;  %v662_v5 = vld [vmem:[#allocation2 + $0x20] sm:$0xff]   ;;  %v671_v7 = vld [vmem:[#allocation2 + $0x48] sm:$0xff]   ;;  %v672_v9 = vld [vmem:[#allocation2 + $0x50] sm:$0xff]  }
  0x15   :  { %569 = vmatprep.subr.bf16.mxu0 %v659_v1  ;;  %v670_v6 = vld [vmem:[#allocation2 + $0x40] sm:$0xff]   ;;  %v663_v8 = vld [vmem:[#allocation2 + $0x28] sm:$0xff]   ;;  %v664_v10 = vld [vmem:[#allocation2 + $0x30] sm:$0xff]  }
  0x16   :  { %591 = vmatprep.subr.bf16.mxu1 %v670_v6  ;;  %v673_v11 = vld [vmem:[#allocation2 + $0x58] sm:$0xff]   ;;  %v674_v13 = vld [vmem:[#allocation2 + $0x60] sm:$0xff]   ;;  %v675_v14 = vld [vmem:[#allocation2 + $0x68] sm:$0xff]  }
  0x17   :  { %592 = vmatpush3.bf16.msra.mxu1 %v670_v6  ;;  %v665_v12 = vld [vmem:[#allocation2 + $0x38] sm:$0xff]   ;;  %v667_v15 = vld [vmem:[%s806_s0 + $0x8] sm:$0xff]   ;;  %v668_v16 = vld [vmem:[%s806_s0 + $0x10] sm:$0xff]  }
  0x18   :  { %570 = vmatpush3.bf16.msra.mxu0 %v659_v1  ;;  %593 = vmatprep.subr.bf16.mxu1 %v671_v7  ;;  %v669_v17 = vld [vmem:[%s806_s0 + $0x18] sm:$0xff]   ;;  %v676_v18 = vld [vmem:[#allocation2 + $0x70] sm:$0xff]   ;;  %v678_v20 = vld [vmem:[#allocation2 + $0x80] sm:$0xff]  }
  0x19   :  { %571 = vmatprep.subr.bf16.mxu0 %v660_v2  ;;  %v677_v19 = vld [vmem:[#allocation2 + $0x78] sm:$0xff]   ;;  %v679_v21 = vld [vmem:[#allocation2 + $0x88] sm:$0xff]   ;;  %v680_v22 = vld [vmem:[#allocation2 + $0x90] sm:$0xff]  }
  0x1a   :  { %v500_v23 = vld [vmem:[%s808_s2] ss:$0 sm:$0xff]  ;;  %v681_v52 = vld [vmem:[#allocation2 + $0x98] sm:$0xff]   ;;  %v683_v54 = vld [vmem:[#allocation2 + $0xa8] sm:$0xff]  }
  0x1b   :  { %594 = vmatpush3.bf16.msra.mxu1 %v671_v7  ;;  %v682_v53 = vld [vmem:[#allocation2 + $0xa0] sm:$0xff]   ;;  %v684_v55 = vld [vmem:[#allocation2 + $0xb0] sm:$0xff]   ;;  %v685_v56 = vld [vmem:[#allocation2 + $0xb8] sm:$0xff]  }
  0x1c   :  { %572 = vmatpush3.bf16.msra.mxu0 %v660_v2  ;;  %595 = vmatprep.subr.bf16.mxu1 %v672_v9  ;;  %v513_v57 = vld [vmem:[%s808_s2 + $0x1] ss:$0 sm:$0xff] }
  0x1d   :  { %573 = vmatprep.subr.bf16.mxu0 %v661_v3 }
  0x1f   :  { %596 = vmatpush3.bf16.msra.mxu1 %v672_v9 }
  0x20   :  { %574 = vmatpush3.bf16.msra.mxu0 %v661_v3  ;;  %597 = vmatprep.subr.bf16.mxu1 %v673_v11 }
  0x21   :  { %575 = vmatprep.subr.bf16.mxu0 %v662_v5 }
  0x23   :  { %598 = vmatpush3.bf16.msra.mxu1 %v673_v11 }
  0x24   :  { %576 = vmatpush3.bf16.msra.mxu0 %v662_v5  ;;  %599 = vmatprep.subr.bf16.mxu1 %v674_v13 }
  0x25   :  { %577 = vmatprep.subr.bf16.mxu0 %v663_v8 }
  0x27   :  { %600 = vmatpush3.bf16.msra.mxu1 %v674_v13 }
  0x28   :  { %578 = vmatpush3.bf16.msra.mxu0 %v663_v8  ;;  %601 = vmatprep.subr.bf16.mxu1 %v675_v14 }
  0x29   :  { %579 = vmatprep.subr.bf16.mxu0 %v664_v10 }
  0x2b   :  { %602 = vmatpush3.bf16.msra.mxu1 %v675_v14 }
  0x2c   :  { %580 = vmatpush3.bf16.msra.mxu0 %v664_v10  ;;  %603 = vmatprep.subr.bf16.mxu1 %v676_v18 }
  0x2d   :  { %581 = vmatprep.subr.bf16.mxu0 %v665_v12 }
  0x2f   :  { %604 = vmatpush3.bf16.msra.mxu1 %v676_v18 }
  0x30   :  { %582 = vmatpush3.bf16.msra.mxu0 %v665_v12  ;;  %605 = vmatprep.subr.bf16.mxu1 %v677_v19 }
  0x31   :  { %615 = vmatprep.subr.bf16.mxu0 %v678_v20 }
  0x33   :  { %584 = vmatmul.mubr.bf16.vlgmr.msra.gmra.mrb[0].mxu0 %v667_v15  ;;  %606 = vmatpush3.bf16.msra.mxu1 %v677_v19 }
  0x34   :  { %587 = vmatprep.mubr.bf16.mxu0 %v668_v16  ;;  %639 = vmatprep.subr.bf16.mxu1 %v678_v20 }
  0x35   :  { %616 = vmatpush3.bf16.msra.mxu0 %v678_v20 }
  0x36   :  { %617 = vmatprep.subr.bf16.mxu0 %v679_v21 }
  0x39   :  { %618 = vmatpush3.bf16.msra.mxu0 %v679_v21 }
  0x3a   :  { %619 = vmatprep.subr.bf16.mxu0 %v680_v22 }
  0x3b   :  { %588 = vmatmul.mubr.bf16.gmra.mrb[4].mxu0 %v669_v17 }
  0x3d   :  { %620 = vmatpush3.bf16.msra.mxu0 %v680_v22 }
  0x3e   :  { %621 = vmatprep.subr.bf16.mxu0 %v681_v52 }
  0x41   :  { %622 = vmatpush3.bf16.msra.mxu0 %v681_v52 }
  0x42   :  { %623 = vmatprep.subr.bf16.mxu0 %v682_v53 }
  0x45   :  { %624 = vmatpush3.bf16.msra.mxu0 %v682_v53 }
  0x46   :  { %625 = vmatprep.subr.bf16.mxu0 %v683_v54 }
  0x49   :  { %626 = vmatpush3.bf16.msra.mxu0 %v683_v54 }
  0x4a   :  { %627 = vmatprep.subr.bf16.mxu0 %v684_v55 }
  0x4d   :  { %628 = vmatpush3.bf16.msra.mxu0 %v684_v55 }
  0x4e   :  { %629 = vmatprep.subr.bf16.mxu0 %v685_v56 }
  0x51   :  { %630 = vmatpush3.bf16.msra.mxu0 %v685_v56 }
 0x106   :  { %v585_v24 = vpop.f32.mrb[0].mxu0 }
 0x107   :  { %v173_v25 = vadd.f32 %v585_v24, %v500_v23  ;;  %v164_v26 = vpop.f32.mrb[1].mxu0 }
 0x108   :  { %v165_v27 = vadd.f32 %v500_v23, %v164_v26  ;;  %v586_v28 = vpop.f32.mrb[2].mxu0 }
 0x109   :  { %v176_v29 = vadd.f32 %v586_v28, %v500_v23  ;;  %v167_v30 = vpop.f32.mrb[3].mxu0  ;;  %v197_v32 = vmax.f32 %v173_v25, 0.0 }
 0x10a   :  { %v168_v31 = vadd.f32 %v500_v23, %v167_v30  ;;  %v195_v34 = vmax.f32 %v165_v27, 0.0 }
 0x10b   :  { %v198_v33 = vmax.f32 %v176_v29, 0.0 }
 0x10c   :  { %v196_v35 = vmax.f32 %v168_v31, 0.0 }
 0x10d   :  { %v221_v36 = vpack.c.bf16 %v198_v33, %v197_v32 }
 0x10e   :  { %v589_v37 = vpop.f32.mrb[4].mxu0  ;;  %v220_v38 = vpack.c.bf16 %v196_v35, %v195_v34 }
 0x10f   :  { %v189_v39 = vadd.f32 %v589_v37, %v500_v23  ;;  %v180_v40 = vpop.f32.mrb[5].mxu0 }
 0x110   :  { %v181_v41 = vadd.f32 %v500_v23, %v180_v40  ;;  %v590_v42 = vpop.f32.mrb[6].mxu0  ;;  %607 = vmatprep.mubr.bf16.mxu1 %v220_v38 }
 0x111   :  { %v192_v43 = vadd.f32 %v590_v42, %v500_v23  ;;  %v183_v44 = vpop.f32.mrb[7].mxu0  ;;  %608 = vmatmul.mubr.bf16.vlgmr.msra.gmra.mrb[0].mxu1 %v221_v36  ;;  %v201_v46 = vmax.f32 %v189_v39, 0.0 }
 0x112   :  { %v184_v45 = vadd.f32 %v500_v23, %v183_v44  ;;  %647 = vmatpush3.bf16.msra.mxu1 %v678_v20  ;;  %v199_v48 = vmax.f32 %v181_v41, 0.0 }
 0x113   :  { %v202_v47 = vmax.f32 %v192_v43, 0.0  ;;  %640 = vmatprep.subr.bf16.mxu1 %v679_v21 }
 0x114   :  { %v200_v49 = vmax.f32 %v184_v45, 0.0 }
 0x115   :  { %v223_v50 = vpack.c.bf16 %v202_v47, %v201_v46 }
 0x116   :  { %v222_v51 = vpack.c.bf16 %v200_v49, %v199_v48  ;;  %648 = vmatpush3.bf16.msra.mxu1 %v679_v21 }
 0x117   :  { %641 = vmatprep.subr.bf16.mxu1 %v680_v22 }
 0x118   :  { %611 = vmatprep.mubr.bf16.mxu1 %v222_v51 }
 0x119   :  { %612 = vmatmul.mubr.bf16.gmra.mrb[4].mxu1 %v223_v50 }
 0x11a   :  { %649 = vmatpush3.bf16.msra.mxu1 %v680_v22  ;;  %v522_v22 = vld [vmem:[%s808_s2 + $0x2] ss:$0 sm:$0xff] }
 0x11b   :  { %642 = vmatprep.subr.bf16.mxu1 %v681_v52 }
 0x11e   :  { %650 = vmatpush3.bf16.msra.mxu1 %v681_v52 }
 0x11f   :  { %643 = vmatprep.subr.bf16.mxu1 %v682_v53 }
 0x122   :  { %651 = vmatpush3.bf16.msra.mxu1 %v682_v53 }
 0x123   :  { %644 = vmatprep.subr.bf16.mxu1 %v683_v54 }
 0x126   :  { %652 = vmatpush3.bf16.msra.mxu1 %v683_v54 }
 0x127   :  { %645 = vmatprep.subr.bf16.mxu1 %v684_v55 }
 0x12a   :  { %653 = vmatpush3.bf16.msra.mxu1 %v684_v55 }
 0x12b   :  { %646 = vmatprep.subr.bf16.mxu1 %v685_v56 }
 0x12e   :  { %654 = vmatpush3.bf16.msra.mxu1 %v685_v56 }
 0x1e4   :  { %v609_v58 = vpop.f32.mrb[0].mxu1 }
 0x1e5   :  { %v319_v59 = vadd.f32 %v609_v58, %v513_v57  ;;  %v310_v60 = vpop.f32.mrb[1].mxu1 }
 0x1e6   :  { %v311_v61 = vadd.f32 %v513_v57, %v310_v60  ;;  %v610_v62 = vpop.f32.mrb[2].mxu1 }
 0x1e7   :  { %686 = vtanh.f32 %v319_v59  ;;  %v322_v63 = vadd.f32 %v610_v62, %v513_v57  ;;  %v313_v0 = vpop.f32.mrb[3].mxu1 }
 0x1e8   :  { %688 = vtanh.f32 %v311_v61  ;;  %v314_v1 = vadd.f32 %v513_v57, %v313_v0 }
 0x1e9   :  { %690 = vtanh.f32 %v322_v63 }
 0x1ea   :  { %692 = vtanh.f32 %v314_v1 }
 0x1ec   :  { %v613_v2 = vpop.f32.mrb[4].mxu1 }
 0x1ed   :  { %v335_v3 = vadd.f32 %v613_v2, %v513_v57  ;;  %v326_v4 = vpop.f32.mrb[5].mxu1 }
 0x1ee   :  { %v327_v5 = vadd.f32 %v513_v57, %v326_v4  ;;  %v614_v6 = vpop.f32.mrb[6].mxu1 }
 0x1ef   :  { %694 = vtanh.f32 %v335_v3  ;;  %v338_v7 = vadd.f32 %v614_v6, %v513_v57  ;;  %v329_v8 = vpop.f32.mrb[7].mxu1 }
 0x1f0   :  { %696 = vtanh.f32 %v327_v5  ;;  %v330_v9 = vadd.f32 %v513_v57, %v329_v8 }
 0x1f1   :  { %v687_v10 = vpop.eup %686  ;;  %698 = vtanh.f32 %v338_v7 }
 0x1f2   :  { %v689_v11 = vpop.eup %688  ;;  %700 = vtanh.f32 %v330_v9 }
 0x1f3   :  { %v691_v12 = vpop.eup %690 }
 0x1f4   :  { %v693_v13 = vpop.eup %692  ;;  %v367_v14 = vpack.c.bf16 %v691_v12, %v687_v10 }
 0x1f5   :  { %v366_v15 = vpack.c.bf16 %v693_v13, %v689_v11 }
 0x1f7   :  { %631 = vmatprep.mubr.bf16.mxu0 %v366_v15 }
 0x1f8   :  { %632 = vmatmul.mubr.bf16.vlgmr.msra.gmra.mrb[8].mxu0 %v367_v14 }
 0x1f9   :  { %v695_v16 = vpop.eup %694 }
 0x1fa   :  { %v697_v17 = vpop.eup %696 }
 0x1fb   :  { %v699_v18 = vpop.eup %698 }
 0x1fc   :  { %v701_v19 = vpop.eup %700  ;;  %v369_v20 = vpack.c.bf16 %v699_v18, %v695_v16 }
 0x1fd   :  { %v368_v21 = vpack.c.bf16 %v701_v19, %v697_v17 }
 0x1ff   :  { %635 = vmatprep.mubr.bf16.mxu1 %v368_v21 }
 0x200   :  { %636 = vmatmul.mubr.bf16.vlgmr.msra.gmra.mrb[8].mxu1 %v369_v20 }
 0x2cb   :  { %v633_v23 = vpop.f32.mrb[8].mxu0 }
 0x2cc   :  { %v465_v24 = vadd.f32 %v633_v23, %v522_v22  ;;  %v456_v25 = vpop.f32.mrb[9].mxu0 }
 0x2cd   :  { %v457_v26 = vadd.f32 %v522_v22, %v456_v25  ;;  %v634_v27 = vpop.f32.mrb[10].mxu0 }
 0x2ce   :  { %489 = vst [vmem:[%s809_s3 + $0x10] sm:$0xff] %v465_v24  ;;  %v468_v28 = vadd.f32 %v634_v27, %v522_v22  ;;  %v459_v29 = vpop.f32.mrb[11].mxu0 }
 0x2cf   :  { %487 = vst [vmem:[%s809_s3] sm:$0xff] %v457_v26  ;;  %v460_v30 = vadd.f32 %v522_v22, %v459_v29 }
 0x2d0   :  { %490 = vst [vmem:[%s809_s3 + $0x18] sm:$0xff] %v468_v28 }
 0x2d1   :  { %488 = vst [vmem:[%s809_s3 + $0x8] sm:$0xff] %v460_v30 }
 0x2d3   :  { %v637_v31 = vpop.f32.mrb[8].mxu1 }
 0x2d4   :  { %v481_v32 = vadd.f32 %v637_v31, %v522_v22  ;;  %v472_v33 = vpop.f32.mrb[9].mxu1 }
 0x2d5   :  { %v473_v34 = vadd.f32 %v522_v22, %v472_v33  ;;  %v638_v35 = vpop.f32.mrb[10].mxu1 }
 0x2d6   :  { %493 = vst [vmem:[%s809_s3 + $0x30] sm:$0xff] %v481_v32  ;;  %v484_v36 = vadd.f32 %v638_v35, %v522_v22  ;;  %v475_v37 = vpop.f32.mrb[11].mxu1 }
 0x2d7   :  { %491 = vst [vmem:[%s809_s3 + $0x20] sm:$0xff] %v473_v34  ;;  %v476_v38 = vadd.f32 %v522_v22, %v475_v37 }
 0x2d8   :  { %494 = vst [vmem:[%s809_s3 + $0x38] sm:$0xff] %v484_v36 }
 0x2d9   :  { %492 = vst [vmem:[%s809_s3 + $0x28] sm:$0xff] %v476_v38 }
 0x2da   :  { %499 = vsyncpa [#allocation3], 1 }

</bundles_post_ra>
